<compile_context>
chip_gen: v5e
topology: v5e:2x2
jax: 0.10.0
libtpu: 0.0.40
codegen_flags: <defaults>
</compile_context>

<pallas_src>
import functools

import jax
import jax.numpy as jnp
from jax.experimental import pallas as pl
from jax.experimental.pallas import tpu as pltpu


def _rmsnorm_kernel(x_ref, g_ref, o_ref, *, eps):
    # x_ref / o_ref: (Bn, C, T) block; g_ref: (1, C, 1) holding g * sqrt(C).
    x = x_ref[...].astype(jnp.float32)
    # Sum of squares over channels (cross-sublane reduce), f32 accumulation.
    ss = jnp.sum(x * x, axis=1, keepdims=True)                 # (Bn, 1, T)
    # rsqrt(max(sum_sq, eps^2)) == 1 / max(||x||, eps)  (matches F.normalize).
    inv = jax.lax.rsqrt(jnp.maximum(ss, eps * eps))            # EUP slot, ~free
    o_ref[...] = (x * (inv * g_ref[...])).astype(o_ref.dtype)


def _ceil_to(x, m):
    return ((x + m - 1) // m) * m


def _block_bytes_per_lane(C, itemsize):
    # VMEM footprint per (batch image, lane element) of one grid step, counting:
    #   2 double-buffered input tiles + 2 output tiles (io dtype, sublane-padded C)
    #   + ~2 f32 working arrays live inside the kernel (x and x*x).
    sub_io = 8 * max(1, 4 // itemsize)        # sublane tile: f32=8, bf16=16, int8=32
    c_io = _ceil_to(C, sub_io)
    c_f32 = _ceil_to(C, 8)
    return 4 * itemsize * c_io + 8 * c_f32


def _plan_tiling(N, C, HW, itemsize, target_block_bytes):
    """Pick (batch_block Bn, spatial_tile T) for the (Bn, C, T) block layout."""
    bytes_per_lane = _block_bytes_per_lane(C, itemsize)

    hw_full = _ceil_to(HW, 128)
    # DMA-efficiency floor: >= ~1 KiB contiguous per channel row (256 lanes f32,
    # 512 lanes bf16), lane-aligned, never larger than the full spatial extent.
    min_tile = min(hw_full, max(128, _ceil_to(1024 // itemsize, 128)))

    # Prefer a fully contiguous C*HW slab per image when it fits the budget.
    if hw_full * bytes_per_lane <= target_block_bytes:
        tile = hw_full
    else:
        tile = (target_block_bytes // (bytes_per_lane * 128)) * 128
        tile = min(hw_full, max(min_tile, tile))

    # Batch several images per grid step so each step moves >= ~1 MiB of real data.
    bn = max(1, min(N, target_block_bytes // (tile * bytes_per_lane)))

    # v7x has 2 TensorCores: make sure the parallel grid has >= 2 steps.
    if pl.cdiv(N, bn) * pl.cdiv(HW, tile) < 2:
        if N >= 2:
            bn = pl.cdiv(N, 2)
        elif HW > 128:
            tile = max(128, _ceil_to(pl.cdiv(HW, 2), 128))

    return bn, tile, bn * tile * bytes_per_lane


def rmsnorm_pallas(x_nchw, g, *, eps=1e-12, spatial_tile=None, batch_block=None,
                   target_block_bytes=16 * 1024 * 1024):
    """x_nchw: (N, C, H, W); g: (1, C, 1, 1). Returns (N, C, H, W)."""
    N, C, H, W = x_nchw.shape
    HW = H * W
    itemsize = jnp.dtype(x_nchw.dtype).itemsize

    bn, tile, block_bytes = _plan_tiling(N, C, HW, itemsize, target_block_bytes)
    if spatial_tile is not None:
        tile = min(_ceil_to(spatial_tile, 128), _ceil_to(HW, 128))
    if batch_block is not None:
        bn = max(1, min(batch_block, N))
    if spatial_tile is not None or batch_block is not None:
        # Recompute the real footprint so the scoped-VMEM limit tracks overrides.
        block_bytes = bn * tile * _block_bytes_per_lane(C, itemsize)

    # NCHW consumed directly as (N, C, H*W): free reshape, no transpose / pad pass.
    x3 = x_nchw.reshape(N, C, HW)
    # Prefold sqrt(C) into g once; (1, C, 1) broadcasts over batch and lanes.
    g3 = g.reshape(1, C, 1).astype(jnp.float32) * (float(C) ** 0.5)

    grid = (pl.cdiv(N, bn), pl.cdiv(HW, tile))

    # Scoped-VMEM limit derived from the actual block footprint (+8 MiB compiler
    # scratch slack); floor of 32 MiB (v5e's default is only 16 MiB), and with the
    # 16 MiB default block budget this stays well inside v7x's 64 MiB VMEM.
    vmem_limit = int(max(32 << 20, block_bytes + (8 << 20)))

    out = pl.pallas_call(
        functools.partial(_rmsnorm_kernel, eps=eps),
        out_shape=jax.ShapeDtypeStruct((N, C, HW), x_nchw.dtype),
        grid_spec=pltpu.PrefetchScalarGridSpec(
            num_scalar_prefetch=0,
            grid=grid,
            in_specs=[
                pl.BlockSpec((bn, C, tile), lambda n, s: (n, 0, s)),
                pl.BlockSpec((1, C, 1), lambda n, s: (0, 0, 0)),
            ],
            out_specs=pl.BlockSpec((bn, C, tile), lambda n, s: (n, 0, s)),
        ),
        compiler_params=pltpu.CompilerParams(
            # Both axes embarrassingly parallel -> megacore sharding on v7x.
            dimension_semantics=("parallel", "parallel"),
            vmem_limit_bytes=vmem_limit,
        ),
    )(x3, g3)

    return out.reshape(N, C, H, W)


def rmsnorm_ref(x_nchw, g, eps=1e-12):
    # Pure-JAX reference of the PyTorch forward: F.normalize(x, dim=1) * g * sqrt(C).
    C = x_nchw.shape[1]
    norm = jnp.sqrt(jnp.sum(x_nchw.astype(jnp.float32) ** 2, axis=1, keepdims=True))
    norm = jnp.maximum(norm, eps)
    return ((x_nchw / norm) * g * (float(C) ** 0.5)).astype(x_nchw.dtype)


if __name__ == "__main__":
    key = jax.random.PRNGKey(0)
    N, C, H, W = 2, 4, 16, 16
    x = jax.random.normal(key, (N, C, H, W), dtype=jnp.float32)
    # Deterministic parameter init, matching nn.Parameter(torch.ones(1, dim, 1, 1)).
    g = jnp.ones((1, C, 1, 1), dtype=jnp.float32)

    y = rmsnorm_pallas(x, g)
    y = jax.block_until_ready(y)

    y_ref = rmsnorm_ref(x, g)
    assert y.shape == (N, C, H, W)
    assert jnp.allclose(y, y_ref, atol=1e-5, rtol=1e-5)
    print("KERNEL_OK")
</pallas_src>

<mosaic_0001>
module attributes {stable_mosaic.version = 11 : i64} {
  func.func @_rmsnorm_kernel(%arg0: i32, %arg1: i32, %arg2: memref<1x4x256xf32, #tpu.memory_space<vmem>>, %arg3: memref<1x4x1xf32, #tpu.memory_space<vmem>>, %arg4: memref<1x4x256xf32, #tpu.memory_space<vmem>>) attributes {dimension_semantics = [#tpu.dimension_semantics<parallel>, #tpu.dimension_semantics<parallel>], iteration_bounds = array<i64: 2, 1>, scalar_prefetch = 0 : i64, scratch_operands = 0 : i64, tpu.core_type = #tpu.core_type<tc>, window_params = [{transform_indices = @transform_0, window_bounds = array<i64: 1, 4, 256>}, {pipeline_mode = #tpu.pipeline_mode<synchronous>, transform_indices = @transform_1, window_bounds = array<i64: 1, 4, 1>}, {transform_indices = @transform_2, window_bounds = array<i64: 1, 4, 256>}]} {
    %c0 = arith.constant 0 : index
    %c0_0 = arith.constant 0 : index
    %c0_1 = arith.constant 0 : index
    %0 = vector.load %arg2[%c0, %c0_0, %c0_1] : memref<1x4x256xf32, #tpu.memory_space<vmem>>, vector<1x4x256xf32>
    %1 = arith.mulf %0, %0 : vector<1x4x256xf32>
    %cst = arith.constant dense<0.000000e+00> : vector<1x256xf32>
    %2 = vector.multi_reduction <add>, %1, %cst [1] : vector<1x4x256xf32> to vector<1x256xf32>
    %3 = vector.shape_cast %2 : vector<1x256xf32> to vector<1x1x256xf32>
    %cst_2 = arith.constant 1.000000e-24 : f32
    %4 = vector.broadcast %cst_2 : f32 to vector<1x1x256xf32>
    %5 = arith.maximumf %3, %4 : vector<1x1x256xf32>
    %6 = math.rsqrt %5 : vector<1x1x256xf32>
    %c0_3 = arith.constant 0 : index
    %c0_4 = arith.constant 0 : index
    %c0_5 = arith.constant 0 : index
    %7 = vector.load %arg3[%c0_3, %c0_4, %c0_5] : memref<1x4x1xf32, #tpu.memory_space<vmem>>, vector<1x4x1xf32>
    %8 = vector.broadcast %6 : vector<1x1x256xf32> to vector<1x4x256xf32>
    %9 = vector.broadcast %7 : vector<1x4x1xf32> to vector<1x4x256xf32>
    %10 = arith.mulf %8, %9 : vector<1x4x256xf32>
    %11 = arith.mulf %0, %10 : vector<1x4x256xf32>
    %c0_6 = arith.constant 0 : index
    %c0_7 = arith.constant 0 : index
    %c0_8 = arith.constant 0 : index
    %12 = vector.load %arg4[%c0_6, %c0_7, %c0_8] : memref<1x4x256xf32, #tpu.memory_space<vmem>>, vector<1x4x256xf32>
    tpu.vector_store %arg4[%c0_6, %c0_7, %c0_8], %11 {strides = array<i32>} : memref<1x4x256xf32, #tpu.memory_space<vmem>>, vector<1x4x256xf32>,
    return
  }
  func.func @transform_0(%arg0: i32, %arg1: i32) -> (i32, i32, i32) {
    %c0_i32 = arith.constant 0 : i32
    %c0_i32_0 = arith.constant 0 : i32
    return %arg0, %c0_i32, %arg1 : i32, i32, i32
  }
  func.func @transform_1(%arg0: i32, %arg1: i32) -> (i32, i32, i32) {
    %c0_i32 = arith.constant 0 : i32
    %c0_i32_0 = arith.constant 0 : i32
    %c0_i32_1 = arith.constant 0 : i32
    %c0_i32_2 = arith.constant 0 : i32
    return %c0_i32, %c0_i32_0, %c0_i32_1 : i32, i32, i32
  }
  func.func @transform_2(%arg0: i32, %arg1: i32) -> (i32, i32, i32) {
    %c0_i32 = arith.constant 0 : i32
    %c0_i32_0 = arith.constant 0 : i32
    return %arg0, %c0_i32, %arg1 : i32, i32, i32
  }
}

</mosaic_0001>

<bundles_post_ra>
// kernel: tpu_custom_call.1
= control target key start
LH: loop header
LB: loop body
LE: loop exit
PB: predicated region body
PF: predicated region fallthrough
CT: control target
= control target key end

     0   :  { %7 = vsyncpa [#allocation3], 0  ;;  %s690_s0 = inlined_call_operand.hbm [shape: f32[2,4,256], index: 0, kind: input, shape index: {}]   ;;  %s691_s1 = inlined_call_operand.vmem [shape: f32[1,4,1], index: 1, kind: input, shape index: {}]   ;;  %s692_s2 = inlined_call_operand.hbm [shape: f32[2,4,256], index: 2, kind: output, shape index: {}]  }
   0x1   :  { %9 = vsyncpa [#allocation3 + $0x1], 0 }
   0x2   :  { %10 = vsyncpa [#allocation4], 0 }
   0x3   :  { %12 = vsyncpa [#allocation4 + $0x1], 0  ;;  %s560_s9 = smov 0   ;;  %s562_s10 = smov 0  }
   0x4   :  { %s564_s11 = smov 0   ;;  %s566_s12 = smov 0  }
   0x5   :  { %s568_s13 = smov 0   ;;  %s570_s14 = smov 0  }
   0x6 LB: > { %s345_s15 = sadd.s32 4294967295, %s542_s14   ;;  %s346_s16 = sadd.s32 4294967294, %s542_s14   ;;  %s542_s14 = sphi %s570_s14, %s18_s14   ;;  %s538_s13 = sphi %s568_s13, %s701_s13   ;;  %s534_s12 = sphi %s566_s12, %s700_s12   ;;  %s530_s11 = sphi %s564_s11, %s699_s11   ;;  %s526_s10 = sphi %s562_s10, %s698_s10   ;;  %s522_s9 = sphi %s560_s9, %s697_s9  }
   0x7   : > { %s30_s17 = sadd.s32 1, %s538_s13  ;;  %s39_s18 = sadd.s32 1, %s530_s11 }
   0x8   : > { %p32_p0 = scmp.ge.s32.totalorder %s30_s17, 2  ;;  %p46_p1 = scmp.ne.s32.totalorder %s530_s11, %s526_s10 }
   0x9   : > { %p47_p2 = scmp.eq.s32.totalorder %s542_s14, 0  ;;  %p52_p3 = scmp.ne.s32.totalorder %s526_s10, %s522_s9 }
   0xa   : > { %s703_s17 = smov (%p32_p0, %s30_s17), 0  ;;  %p53_p5 = scmp.eq.s32.totalorder %s345_s15, 0 }
   0xb   : > { %p601_p4 = por %p47_p2, %p46_p1  ;;  %s34_s20 = ssub.s32 %s538_s13, %s703_s17 }
   0xc   : > { %p99_p6 = scmp.eq.s32.totalorder %s345_s15, 1  ;;  %p37_p7 = scmp.eq.s32.totalorder %s34_s20, 0 }
   0xd   : > { %p607_p8 = por %p53_p5, %p52_p3  ;;  %p105_p10 = scmp.eq.s32.totalorder %s346_s16, 1 }
   0xe   : > { %p611_p9 = por %p99_p6, %p46_p1  ;;  %p348_p12 = scmp.ge.s32.totalorder %s542_s14, 2 }
   0xf   : > { %s616_s23 = scalar_select %p37_p7, %s530_s11, %s39_s18  }
  0x10   : > { %p618_p11 = por %p105_p10, %p52_p3  ;;  %p374_p13 = scmp.lt.s32.totalorder %s542_s14, 2 }
  0x11   : > { %s128_s25 = sand.u32 1, %s530_s11   ;;  %s360_s27 = sshll.u32 %s538_s13, 3 }
  0x12   : > { %s349_s26 = sshll.u32 %s128_s25, 3  ;;  %s139_s30 = scalar_lea.hbm %s690_s0, %s360_s27 }
  0x13   : > { %s132_s3 = scalar_lea.vmem [#allocation2], %s349_s26  ;;  %s141_s5 = sshll.u32 %s139_s30, 4  ;;  %s142_s5 = int_to_ptr.hbm [resolvable:$true] %s141_s5 }
  0x14   : > { %s143_s4 = sshll.u32 %s132_s3, 4  ;;  %p367_p0 = pnand %p374_p13, %p601_p4  ;;  %s144_s4 = int_to_ptr.vmem [resolvable:$true] %s143_s4 }
  0x15   : > { %p352_p1 = scmp.ge.s32.totalorder %s542_s14, 1  ;;  %p148_p2 = scmp.lt.s32.totalorder %s542_s14, 3 }
  0x16   : > { %s129_s6 = scalar_lea.sflag [#allocation3], %s128_s25 }
  0x17   : > { %369 = dma.hbm_to_vmem [thread:$0]  (!%p367_p0), %s142_s5, 128, %s144_s4, %s129_s6  }
  0x18   : > { %p149_p3 = pnand %p352_p1, %p148_p2 }
  0x19   : > { %s634_s7 = sand.u32 (!%p149_p3), 1, %s526_s10  }
  0x1a   : > { %152 = sbr.rel (%p149_p3) target bundleno = 159 (0x9f), region = 28  ;;  %s353_s8 = sshll.u32 (!%p149_p3), %s634_s7, 3 }
  0x1b   : > { %s155_s15 = scalar_lea.sflag (!%p149_p3), [#allocation3], %s634_s7  ;;  %s158_s16 = scalar_lea.vmem (!%p149_p3), [#allocation2], %s353_s8 }
  0x1f   : > { %513 = dma.done.wait (%p607_p8), %s155_s15, 128  }
  0x20   : > { %515 = vsyncadd (%p607_p8), %s155_s15, 4294967168  ;;  %v544_v0 = vmov 0   ;;  %v227_v1 = vld [vmem:[%s691_s1] sm:$0xf]  ;;  %v182_v2 = vld [vmem:[%s158_s16] sm:$0xff]  ;;  %vm190_vm0 = vcmask 1043456  }
  0x21   : > { %425 = vset.pattern.permute.xlu0 %v544_v0  ;;  %v183_v3 = vmul.f32 %v182_v2, %v182_v2  ;;  %s361_s20 = sshll.u32 %s534_s12, 3  ;;  %s179_s27 = scalar_lea.vmem [#allocation5], %s353_s8 }
  0x22   : > { %230 = vperm.xlu0 %425, %v227_v1   ;;  %s256_s26 = scalar_lea.hbm %s692_s2, %s361_s20  ;;  %s258_s28 = sshll.u32 %s179_s27, 4  ;;  %s259_s28 = int_to_ptr.vmem [resolvable:$true] %s258_s28 }
  0x23   : > { %185 = vst [vmem:[#allocation1] ss:$2 sm:$0xff] %v183_v3  ;;  %s260_s29 = sshll.u32 %s256_s26, 4  ;;  %s243_s12 = scalar_lea.sflag [#allocation4], %s634_s7  ;;  %s261_s29 = int_to_ptr.hbm [resolvable:$true] %s260_s29 }
  0x24   : > { %s474_s30 = sshra.s32 %s261_s29, 4  ;;  %s480_s6 = scalar_lea.hbm %s692_s2, 16  ;;  %s475_s30 = int_to_ptr.hbm [resolvable:$true] %s474_s30 }
  0x25   : > { %s476_s3 = scalar_lea.hbm %s475_s30, 8  ;;  %p481_p7 = scmp.lt.s32.totalorder %s475_s30, %s692_s2 }
  0x26   : > { %p477_p4 = scmp.ne.s32.totalorder %s475_s30, %s476_s3  ;;  %p482_p8 = scmp.lt.s32.totalorder %s480_s6, %s476_s3 }
  0x28   : > { %p478_p5 = pnand %p477_p4, %p611_p9  ;;  %p483_p10 = por %p482_p8, %p481_p7 }
  0x2a   : > { %v187_v4 = vld.sshfl [vmem:[#allocation1 + $0x8] sm:$0xff pattern:$0x75316420]  ;;  %v186_v5 = vld.sshfl [vmem:[#allocation1] sm:$0xff pattern:$0x75316420]  ;;  %p479_p6 = pneg %p478_p5 }
  0x2b   : > { %v198_v6 = vsel %vm190_vm0, %v187_v4, 0.0  ;;  %v191_v7 = vsel %vm190_vm0, %v186_v5, 0.0 }
  0x2c   : > { %v199_v8 = vrot.slane %v198_v6, 4  ;;  %v192_v9 = vrot.slane %v191_v7, 4  ;;  %p484_p13 = pnand %p483_p10, %p479_p6 }
  0x2e   : > { %v200_v10 = vadd.f32 %v199_v8, %v198_v6  ;;  %v193_v11 = vadd.f32 %v192_v9, %v191_v7 }
  0x30   : > { %v201_v12 = vrot.slane %v200_v10, 2  ;;  %v194_v13 = vrot.slane %v193_v11, 2 }
  0x32   : > { %v202_v14 = vadd.f32 %v201_v12, %v200_v10  ;;  %v195_v15 = vadd.f32 %v194_v13, %v193_v11 }
  0x34   : > { %v203_v16 = vrot.slane %v202_v14, 1  ;;  %v196_v17 = vrot.slane %v195_v15, 1 }
  0x36   : > { %v204_v18 = vadd.f32 %v203_v16, %v202_v14  ;;  %v197_v19 = vadd.f32 %v196_v17, %v195_v15 }
  0x38   : > { %v206_v20 = vmax.f32 %v204_v18, 1e-24  ;;  %v205_v21 = vmax.f32 %v197_v19, 1e-24 }
  0x3a   : > { %426 = vrsqrt.f32 %v206_v20  ;;  %vm223_vm1 = vweird.f32 %v206_v20  ;;  %vm213_vm3 = vweird.f32 %v205_v21 }
  0x3b   : > { %428 = vrsqrt.f32 %v205_v21 }
  0x40   : > { %v427_v22 = vpop.eup %426 }
  0x41   : > { %v429_v23 = vpop.eup %428  ;;  %v218_v24 = vmul.f32 %v427_v22, %v206_v20  ;;  %vm224_vm2 = vweird.f32 %v427_v22 }
  0x42   : > { %v208_v25 = vmul.f32 %v429_v23, %v205_v21  ;;  %vm214_vm4 = vweird.f32 %v429_v23  ;;  %vm225_vm5 = vmor %vm223_vm1, %vm224_vm2 }
  0x43   : > { %v219_v26 = vmul.f32 %v427_v22, %v218_v24  ;;  %vm215_vm6 = vmor %vm213_vm3, %vm214_vm4 }
  0x44   : > { %v209_v27 = vmul.f32 %v429_v23, %v208_v25 }
  0x45   : > { %v220_v28 = vmul.f32 0.5, %v219_v26 }
  0x46   : > { %v210_v29 = vmul.f32 0.5, %v209_v27 }
  0x47   : > { %v221_v30 = vsub.f32 1.5, %v220_v28 }
  0x48   : > { %v211_v31 = vsub.f32 1.5, %v210_v29 }
  0x49   : > { %v222_v32 = vmul.f32 %v427_v22, %v221_v30 }
  0x4a   : > { %v212_v33 = vmul.f32 %v429_v23, %v211_v31 }
  0x4b   : > { %v226_v34 = vsel %vm225_vm5, %v427_v22, %v222_v32 }
  0x4c   : > { %v216_v36 = vsel %vm215_vm6, %v429_v23, %v212_v33 }
  0x94   : > { %v231_v35 = vpop.permute.xlu0 %230 }
  0x95   : > { %v234_v37 = vmul.f32 %v231_v35, %v226_v34  ;;  %v233_v38 = vmul.f32 %v231_v35, %v216_v36 }
  0x97   : > { %v237_v39 = vrot.slane %v234_v37, 4 }
  0x99   : > { %v238_v40 = vsel %vm190_vm0, %v233_v38, %v237_v39 }
  0x9a   : > { %v240_v41 = vmul.f32 %v238_v40, %v182_v2 }
  0x9c   : > { %241 = vst [vmem:[%s179_s27] sm:$0xff] %v240_v41 }
  0x9d   : > { %487 = shalt.err (!%p484_p13)
}
  0x9e   : > { %364 = dma.vmem_to_hbm [thread:$0]  (%p611_p9), %s259_s28, 128, %s261_s29, %s243_s12  }
  0x9f PF: > { %s272_s7 = sand.u32 1, %s522_s9   ;;  %p371_p0 = pnand %p348_p12, %p618_p11 }
  0xa0   : > { %s273_s16 = scalar_lea.sflag [#allocation4], %s272_s7 }
  0xa1   : > { %p372_p1 = pneg %p371_p0 }
  0xa3   : > { %517 = dma.done.wait (%p372_p1), %s273_s16, 128  }
  0xa4   : > { %519 = vsyncadd (%p372_p1), %s273_s16, 4294967168  ;;  %s18_s14 = sadd.s32 1, %s542_s14   ;;  %s697_s9 = smov %s526_s10 }
  0xa5   : > { %p15_p2 = scmp.ge.s32.totalorder %s18_s14, 4   ;;  %s698_s10 = smov %s530_s11 }
  0xa6   : > { %s699_s11 = smov %s616_s23  ;;  %s700_s12 = smov %s538_s13 }
  0xa7   : > { %s701_s13 = smov %s703_s17  ;;  %17 = sbr.rel (!%p15_p2) target bundleno = 6 (0x6), region = 73 }
  0xac   :  { %279 = vsyncpa [#allocation3], 1 }
  0xad   :  { %281 = vsyncpa [#allocation3 + $0x1], 1 }
  0xae   :  { %282 = vsyncpa [#allocation4], 1 }
  0xaf   :  { %284 = vsyncpa [#allocation4 + $0x1], 1 }

</bundles_post_ra>
